<compile_context>
chip_gen: v7x
topology: tpu7x:2x2x1
jax: 0.10.0
libtpu: 0.0.40
codegen_flags: <defaults>
</compile_context>

<pallas_src>
import functools

import jax
import jax.numpy as jnp
from jax.experimental import pallas as pl
from jax.experimental.pallas import tpu as pltpu

_SQRT_HALF = 0.7071067811865476


def _fused_rebuild_kernel(x_ref, w1g_ref, b1_ref, w1x_ref, w2_ref, b2_ref,
                          o_ref, *, n_chunks, chunk):
    """One batch row, fully fused: max-pool -> gb -> token-chunked MLP.

    x_ref:   (1, N, C) f32 (whole row, resident)     o_ref: (1, N, O)
    w1g_ref: (C, H) f32    b1_ref: (1, H) f32
    w1x_ref: (C, H) bf16   w2_ref: (H, O) bf16       b2_ref: (1, O) f32
    """
    C = x_ref.shape[-1]
    align = chunk & (-chunk)   # largest power-of-two factor: alignment hint

    # ---- global feature: g = max over tokens (f32) -------------------------
    if n_chunks == 1:
        gmax = jnp.max(x_ref[0].astype(jnp.float32), axis=0, keepdims=True)
    else:
        def max_body(i, gm):
            start = pl.multiple_of(i * chunk, align)
            xc = x_ref[0, pl.ds(start, chunk), :].astype(jnp.float32)
            return jnp.maximum(gm, jnp.max(xc, axis=0, keepdims=True))
        gmax = jax.lax.fori_loop(
            0, n_chunks, max_body,
            jnp.full((1, C), -jnp.inf, jnp.float32),
            unroll=n_chunks <= 8)

    # gb = g @ W1[:C] + b1  — one-row f32 MXU matmul, once per batch row.
    gb = jnp.dot(gmax, w1g_ref[...],
                 preferred_element_type=jnp.float32) + b1_ref[...]        # (1, H)

    # ---- token-chunked MLP over the resident row ---------------------------
    def mlp_body(i, carry):
        start = pl.multiple_of(i * chunk, align)
        xc = x_ref[0, pl.ds(start, chunk), :].astype(w1x_ref.dtype)       # (chunk, C)
        h = jnp.dot(xc, w1x_ref[...],
                    preferred_element_type=jnp.float32) + gb              # (chunk, H)
        # exact erf GELU (PyTorch nn.GELU default), kept in f32
        h = 0.5 * h * (1.0 + jax.lax.erf(h * jnp.float32(_SQRT_HALF)))
        out = jnp.dot(h.astype(w2_ref.dtype), w2_ref[...],
                      preferred_element_type=jnp.float32) + b2_ref[...]   # (chunk, O)
        o_ref[0, pl.ds(start, chunk), :] = out.astype(o_ref.dtype)
        return carry

    if n_chunks == 1:
        mlp_body(0, 0)
    else:
        jax.lax.fori_loop(0, n_chunks, mlp_body, 0, unroll=n_chunks <= 4)


def _pick_chunk(n, target):
    """Largest divisor of n that is a multiple of 8 and <= target; else n."""
    t = min(target, n)
    t -= t % 8
    while t >= 8:
        if n % t == 0:
            return t
        t -= 8
    return n


def simple_rebuild_fc_layer(rec_feature, params, step, out_dim=3,
                            token_chunk=512, compute_dtype=jnp.bfloat16):
    """rec_feature: (B, N, C).  Returns (B, N, step, out_dim)."""
    B, N, C = rec_feature.shape
    w1, b1, w2, b2 = params   # (2C,H), (1,H), (H,step*out_dim), (1,step*out_dim)
    two_c, H = w1.shape
    O = w2.shape[1]
    assert two_c == 2 * C and O == step * out_dim

    chunk = _pick_chunk(N, token_chunk)
    n_chunks = N // chunk

    # Pre-split / pre-cast weights once in the wrapper (cheap, stays in HBM).
    w1_g = w1[:C].astype(jnp.float32)            # (C, H) f32: one-row matmul per row
    w1_x = w1[C:].astype(compute_dtype)          # (C, H) bf16
    w2_c = w2.astype(compute_dtype)              # (H, O) bf16
    b1_c = b1.astype(jnp.float32)                # (1, H)
    b2_c = b2.astype(jnp.float32)                # (1, O)

    out_dtype = rec_feature.dtype
    # VMEM budget: default-double-buffered blocks + generous intermediate slack.
    est = (2 * N * C * rec_feature.dtype.itemsize          # x row (double-buffered)
           + 2 * N * O * jnp.dtype(out_dtype).itemsize     # out row
           + 2 * (C * H * 4 + C * H * 2 + H * O * 2 + H * 4 + O * 4)  # weights/biases
           + 4 * chunk * (C + 2 * H + O) * 4)              # live intermediates
    vmem_limit = int(min(64 * 1024 * 1024,
                         max(32 * 1024 * 1024, est + (4 << 20))))

    kernel = functools.partial(_fused_rebuild_kernel,
                               n_chunks=n_chunks, chunk=chunk)

    out = pl.pallas_call(
        kernel,
        out_shape=jax.ShapeDtypeStruct((B, N, O), out_dtype),
        grid_spec=pltpu.PrefetchScalarGridSpec(
            num_scalar_prefetch=0,
            grid=(B,),
            in_specs=[
                pl.BlockSpec((1, N, C), lambda b: (b, 0, 0)),  # whole row: 1 HBM read
                pl.BlockSpec((C, H), lambda b: (0, 0)),        # resident weights
                pl.BlockSpec((1, H), lambda b: (0, 0)),
                pl.BlockSpec((C, H), lambda b: (0, 0)),
                pl.BlockSpec((H, O), lambda b: (0, 0)),
                pl.BlockSpec((1, O), lambda b: (0, 0)),
            ],
            out_specs=pl.BlockSpec((1, N, O), lambda b: (b, 0, 0)),
        ),
        compiler_params=pltpu.CompilerParams(
            dimension_semantics=("parallel",),   # batch rows split across TCs (v7x)
            vmem_limit_bytes=vmem_limit),
    )(rec_feature, w1_g, b1_c, w1_x, w2_c, b2_c)

    rebuild_pc = out.reshape(B, N, step, out_dim)   # contiguous last-dim split: free
    assert rebuild_pc.shape[1] == rec_feature.shape[1]
    return rebuild_pc


def init_params(key, input_dims, hidden_dim, step, out_dim):
    """Deterministic synthetic init for Mlp(input_dims, hidden_dim, step*out_dim)."""
    k1, k2, k3, k4 = jax.random.split(key, 4)
    out_features = step * out_dim
    w1 = jax.random.normal(k1, (input_dims, hidden_dim), jnp.float32) * 0.02
    b1 = jax.random.normal(k2, (1, hidden_dim), jnp.float32) * 0.02
    w2 = jax.random.normal(k3, (hidden_dim, out_features), jnp.float32) * 0.02
    b2 = jax.random.normal(k4, (1, out_features), jnp.float32) * 0.02
    return w1, b1, w2, b2


def _reference(rec_feature, params, step, out_dim):
    """Pure-JAX f32 reference mirroring the PyTorch forward exactly."""
    w1, b1, w2, b2 = params
    B, N, C = rec_feature.shape
    g = jnp.max(rec_feature, axis=1)                                    # (B, C)
    patch = jnp.concatenate(
        [jnp.broadcast_to(g[:, None, :], (B, N, C)), rec_feature], -1)  # (B, N, 2C)
    h = patch @ w1 + b1
    h = 0.5 * h * (1.0 + jax.lax.erf(h / jnp.sqrt(2.0)))
    out = h @ w2 + b2
    return out.reshape(B, -1, step, out_dim)


if __name__ == "__main__":
    # Small shapes consistent with the module (BNC input, Mlp(2C -> H -> step*out_dim)).
    B, N, C = 2, 256, 16
    step, out_dim, hidden_dim = 4, 3, 32
    input_dims = 2 * C

    key = jax.random.PRNGKey(0)
    k_x, k_p = jax.random.split(key)
    rec_feature = jax.random.normal(k_x, (B, N, C), jnp.float32)
    params = init_params(k_p, input_dims, hidden_dim, step, out_dim)

    out = simple_rebuild_fc_layer(rec_feature, params, step, out_dim,
                                  token_chunk=512)
    out = jax.block_until_ready(out)

    ref = _reference(rec_feature, params, step, out_dim)
    assert out.shape == (B, N, step, out_dim)
    # bf16 MXU matmuls (token half) with f32 accumulation; global-feature half,
    # max, GELU and biases stay f32 -> dominant error is bf16 rounding of x/h.
    assert jnp.allclose(out, ref, atol=1e-2, rtol=1e-2)

    print("KERNEL_OK")
</pallas_src>

<mosaic_0001>
module attributes {stable_mosaic.version = 11 : i64} {
  func.func @_fused_rebuild_kernel(%arg0: i32, %arg1: memref<1x256x16xf32, #tpu.memory_space<vmem>>, %arg2: memref<16x32xf32, #tpu.memory_space<vmem>>, %arg3: memref<1x32xf32, #tpu.memory_space<vmem>>, %arg4: memref<16x32xbf16, #tpu.memory_space<vmem>>, %arg5: memref<32x12xbf16, #tpu.memory_space<vmem>>, %arg6: memref<1x12xf32, #tpu.memory_space<vmem>>, %arg7: memref<1x256x12xf32, #tpu.memory_space<vmem>>) attributes {dimension_semantics = [#tpu.dimension_semantics<parallel>], iteration_bounds = array<i64: 2>, scalar_prefetch = 0 : i64, scratch_operands = 0 : i64, tpu.core_type = #tpu.core_type<tc>, window_params = [{transform_indices = @transform_0, window_bounds = array<i64: 1, 256, 16>}, {pipeline_mode = #tpu.pipeline_mode<synchronous>, transform_indices = @transform_1, window_bounds = array<i64: 16, 32>}, {pipeline_mode = #tpu.pipeline_mode<synchronous>, transform_indices = @transform_2, window_bounds = array<i64: 1, 32>}, {pipeline_mode = #tpu.pipeline_mode<synchronous>, transform_indices = @transform_3, window_bounds = array<i64: 16, 32>}, {pipeline_mode = #tpu.pipeline_mode<synchronous>, transform_indices = @transform_4, window_bounds = array<i64: 32, 12>}, {pipeline_mode = #tpu.pipeline_mode<synchronous>, transform_indices = @transform_5, window_bounds = array<i64: 1, 12>}, {transform_indices = @transform_6, window_bounds = array<i64: 1, 256, 12>}]} {
    %c0 = arith.constant 0 : index
    %c0_0 = arith.constant 0 : index
    %c0_1 = arith.constant 0 : index
    %0 = vector.load %arg1[%c0, %c0_0, %c0_1] : memref<1x256x16xf32, #tpu.memory_space<vmem>>, vector<1x256x16xf32>
    %1 = vector.shape_cast %0 : vector<1x256x16xf32> to vector<256x16xf32>
    %cst = arith.constant dense<0xFF800000> : vector<16xf32>
    %2 = vector.multi_reduction <maximumf>, %1, %cst [0] : vector<256x16xf32> to vector<16xf32>
    %3 = vector.shape_cast %2 : vector<16xf32> to vector<1x16xf32>
    %c0_2 = arith.constant 0 : index
    %c0_3 = arith.constant 0 : index
    %4 = vector.load %arg2[%c0_2, %c0_3] : memref<16x32xf32, #tpu.memory_space<vmem>>, vector<16x32xf32>
    %cst_4 = arith.constant dense<0.000000e+00> : vector<1x32xf32>
    %5 = tpu.matmul %3, %4, %cst_4 {dimension_numbers = #tpu.dot_dimension_numbers<[1], [0], [0], [1], [0, 0, 1, 1], [], []>} : vector<1x16xf32>, vector<16x32xf32>, vector<1x32xf32> -> vector<1x32xf32>
    %c0_5 = arith.constant 0 : index
    %c0_6 = arith.constant 0 : index
    %6 = vector.load %arg3[%c0_5, %c0_6] : memref<1x32xf32, #tpu.memory_space<vmem>>, vector<1x32xf32>
    %7 = arith.addf %5, %6 : vector<1x32xf32>
    %c0_i32 = arith.constant 0 : i32
    %8 = tpu.assume_multiple %c0_i32, 256 : i32
    %c0_7 = arith.constant 0 : index
    %9 = arith.index_cast %8 : i32 to index
    %c0_8 = arith.constant 0 : index
    %10 = vector.load %arg1[%c0_7, %9, %c0_8] : memref<1x256x16xf32, #tpu.memory_space<vmem>>, vector<1x256x16xf32>
    %11 = vector.shape_cast %10 : vector<1x256x16xf32> to vector<256x16xf32>
    %12 = arith.truncf %11 : vector<256x16xf32> to vector<256x16xbf16>
    %c0_9 = arith.constant 0 : index
    %c0_10 = arith.constant 0 : index
    %13 = vector.load %arg4[%c0_9, %c0_10] : memref<16x32xbf16, #tpu.memory_space<vmem>>, vector<16x32xbf16>
    %cst_11 = arith.constant dense<0.000000e+00> : vector<256x32xf32>
    %14 = tpu.matmul %12, %13, %cst_11 {dimension_numbers = #tpu.dot_dimension_numbers<[1], [0], [0], [1], [0, 0, 1, 1], [], []>} : vector<256x16xbf16>, vector<16x32xbf16>, vector<256x32xf32> -> vector<256x32xf32>
    %15 = vector.broadcast %7 : vector<1x32xf32> to vector<256x32xf32>
    %16 = arith.addf %14, %15 : vector<256x32xf32>
    %cst_12 = arith.constant 5.000000e-01 : f32
    %17 = vector.broadcast %cst_12 : f32 to vector<256x32xf32>
    %18 = arith.mulf %17, %16 : vector<256x32xf32>
    %cst_13 = arith.constant 0.707106769 : f32
    %19 = vector.broadcast %cst_13 : f32 to vector<256x32xf32>
    %20 = arith.mulf %16, %19 : vector<256x32xf32>
    %21 = math.erf %20 : vector<256x32xf32>
    %cst_14 = arith.constant 1.000000e+00 : f32
    %22 = vector.broadcast %cst_14 : f32 to vector<256x32xf32>
    %23 = arith.addf %22, %21 : vector<256x32xf32>
    %24 = arith.mulf %18, %23 : vector<256x32xf32>
    %25 = arith.truncf %24 : vector<256x32xf32> to vector<256x32xbf16>
    %c0_15 = arith.constant 0 : index
    %c0_16 = arith.constant 0 : index
    %26 = vector.load %arg5[%c0_15, %c0_16] : memref<32x12xbf16, #tpu.memory_space<vmem>>, vector<32x12xbf16>
    %cst_17 = arith.constant dense<0.000000e+00> : vector<256x12xf32>
    %27 = tpu.matmul %25, %26, %cst_17 {dimension_numbers = #tpu.dot_dimension_numbers<[1], [0], [0], [1], [0, 0, 1, 1], [], []>} : vector<256x32xbf16>, vector<32x12xbf16>, vector<256x12xf32> -> vector<256x12xf32>
    %c0_18 = arith.constant 0 : index
    %c0_19 = arith.constant 0 : index
    %28 = vector.load %arg6[%c0_18, %c0_19] : memref<1x12xf32, #tpu.memory_space<vmem>>, vector<1x12xf32>
    %29 = vector.broadcast %28 : vector<1x12xf32> to vector<256x12xf32>
    %30 = arith.addf %27, %29 : vector<256x12xf32>
    %c0_20 = arith.constant 0 : index
    %31 = arith.index_cast %8 : i32 to index
    %c0_21 = arith.constant 0 : index
    %32 = vector.load %arg7[%c0_20, %31, %c0_21] : memref<1x256x12xf32, #tpu.memory_space<vmem>>, vector<1x256x12xf32>
    %33 = vector.shape_cast %32 : vector<1x256x12xf32> to vector<256x12xf32>
    %34 = vector.shape_cast %30 : vector<256x12xf32> to vector<1x256x12xf32>
    tpu.vector_store %arg7[%c0_20, %31, %c0_21], %34 {strides = array<i32>} : memref<1x256x12xf32, #tpu.memory_space<vmem>>, vector<1x256x12xf32>,
    return
  }
  func.func @transform_0(%arg0: i32) -> (i32, i32, i32) {
    %c0_i32 = arith.constant 0 : i32
    %c0_i32_0 = arith.constant 0 : i32
    %c0_i32_1 = arith.constant 0 : i32
    return %arg0, %c0_i32, %c0_i32_0 : i32, i32, i32
  }
  func.func @transform_1(%arg0: i32) -> (i32, i32) {
    %c0_i32 = arith.constant 0 : i32
    %c0_i32_0 = arith.constant 0 : i32
    %c0_i32_1 = arith.constant 0 : i32
    return %c0_i32, %c0_i32_0 : i32, i32
  }
  func.func @transform_2(%arg0: i32) -> (i32, i32) {
    %c0_i32 = arith.constant 0 : i32
    %c0_i32_0 = arith.constant 0 : i32
    %c0_i32_1 = arith.constant 0 : i32
    return %c0_i32, %c0_i32_0 : i32, i32
  }
  func.func @transform_3(%arg0: i32) -> (i32, i32) {
    %c0_i32 = arith.constant 0 : i32
    %c0_i32_0 = arith.constant 0 : i32
    %c0_i32_1 = arith.constant 0 : i32
    return %c0_i32, %c0_i32_0 : i32, i32
  }
  func.func @transform_4(%arg0: i32) -> (i32, i32) {
    %c0_i32 = arith.constant 0 : i32
    %c0_i32_0 = arith.constant 0 : i32
    %c0_i32_1 = arith.constant 0 : i32
    return %c0_i32, %c0_i32_0 : i32, i32
  }
  func.func @transform_5(%arg0: i32) -> (i32, i32) {
    %c0_i32 = arith.constant 0 : i32
    %c0_i32_0 = arith.constant 0 : i32
    %c0_i32_1 = arith.constant 0 : i32
    return %c0_i32, %c0_i32_0 : i32, i32
  }
  func.func @transform_6(%arg0: i32) -> (i32, i32, i32) {
    %c0_i32 = arith.constant 0 : i32
    %c0_i32_0 = arith.constant 0 : i32
    %c0_i32_1 = arith.constant 0 : i32
    return %arg0, %c0_i32, %c0_i32_0 : i32, i32, i32
  }
}

</mosaic_0001>

<bundles_post_ra>
// kernel: tpu_custom_call.1
= control target key start
LH: loop header
LB: loop body
LE: loop exit
PB: predicated region body
PF: predicated region fallthrough
CT: control target
= control target key end

     0   :  { %s1489_s21 = smov 0   ;;  %s1951_s0 = inlined_call_operand.vmem [shape: f32[2,256,16], index: 0, kind: input, shape index: {}]   ;;  %s1952_s1 = inlined_call_operand.vmem [shape: f32[16,32], index: 1, kind: input, shape index: {}]   ;;  %s1953_s2 = inlined_call_operand.vmem [shape: f32[1,32], index: 2, kind: input, shape index: {}]   ;;  %s1954_s3 = inlined_call_operand.vmem [shape: bf16[16,32], index: 3, kind: input, shape index: {}]   ;;  %s1955_s4 = inlined_call_operand.vmem [shape: bf16[32,12], index: 4, kind: input, shape index: {}]   ;;  %s1956_s5 = inlined_call_operand.vmem [shape: f32[1,12], index: 5, kind: input, shape index: {}]   ;;  %s1957_s6 = inlined_call_operand.vmem [shape: f32[2,256,12], index: 6, kind: output, shape index: {}]  }
   0x1 LB: > { %s1197_s22 = sadd.s32 4294967295, %s1449_s21   ;;  %p1201_p0 = scmp.ge.s32.totalorder %s1449_s21, 1  ;;  %s1449_s21 = sphi %s1489_s21, %s16_s21  }
   0x2   : > { %p212_p1 = scmp.lt.s32.totalorder %s1449_s21, 3 }
   0x4   : > { %p213_p2 = pnand %p1201_p0, %p212_p1 }
   0x5   : > { %v355_v0 = vld [vmem:[%s1952_s1] sm:$0xff] (!%p213_p2)  ;;  %v356_v1 = vld [vmem:[%s1952_s1 + $0x8] sm:$0xff] (!%p213_p2)  ;;  %v1451_v3 = vmov (!%p213_p2), 0.0|0.0   ;;  %vm1452_vm0 = vmmov (!%p213_p2), 0   ;;  %v1453_v5 = vmov (!%p213_p2), 0.0   ;;  %p242_p3 = scmp.lt.s32.totalorder (!%p213_p2), %s1197_s22, 1 }
   0x6   : > { %216 = sbr.rel (%p213_p2) target bundleno = 565 (0x235), region = 44  ;;  %v1506_v2 = vld [vmem:[%s1954_s3] sm:$0xff] (!%p213_p2)   ;;  %1362 = vmatprep.subr.bf16.mxu1 (!%p213_p2), %v1451_v3  ;;  %v1363_v4 = vpack.c.bf16 (!%p213_p2), %v356_v1, %v355_v0  ;;  %1289 = vmatprep.mubr.msk.f32.mxu1 (!%p213_p2), %vm1452_vm0, %v1453_v5  ;;  %vm285_vm1 = vcmask (!%p213_p2), 130048   ;;  %vm899_vm2 = vcmask (!%p213_p2), 261120   ;;  %vm1109_vm3 = vcmask (!%p213_p2), 97280  }
   0x8   : > { %1364 = vmatpush3.bf16.msra.mxu1 (!%p213_p2), %v1363_v4 }
   0x9   : > { %1292 = vmatprep.subr.bf16.mxu1 (!%p213_p2), %v1506_v2 }
   0xd   : > { %s1959_s22 = smov (!%p242_p3, %s1197_s22), 1 }
   0xe   : > { %s1245_s29 = sshll.u32 %s1959_s22, 8 }
   0xf   : > { %s1517_s8 = scalar_lea.vmem %s1951_s0, %s1245_s29  ;;  %s1850_s19 = scalar_lea.vmem %s1957_s6, %s1245_s29 }
  0x10   : > { %v1520_v6 = vld [vmem:[%s1517_s8] sm:$0xff]  ;;  %v1523_v7 = vld [vmem:[%s1517_s8 + $0x8] sm:$0xff]  ;;  %v1526_v8 = vld [vmem:[%s1517_s8 + $0x10] sm:$0xff] }
  0x11   : > { %v1529_v9 = vld [vmem:[%s1517_s8 + $0x18] sm:$0xff]  ;;  %v1532_v10 = vld [vmem:[%s1517_s8 + $0x20] sm:$0xff]  ;;  %v1535_v11 = vld [vmem:[%s1517_s8 + $0x28] sm:$0xff]  ;;  %v286_v12 = vsel %vm285_vm1, %v1520_v6, -inf  ;;  %v287_v13 = vsel %vm285_vm1, %v1523_v7, -inf  ;;  %v288_v14 = vsel %vm285_vm1, %v1526_v8, -inf }
  0x12   : > { %v1544_v15 = vld [vmem:[%s1517_s8 + $0x30] sm:$0xff]  ;;  %v1547_v16 = vld [vmem:[%s1517_s8 + $0x38] sm:$0xff]  ;;  %v1550_v17 = vld [vmem:[%s1517_s8 + $0x40] sm:$0xff]  ;;  %v289_v18 = vsel %vm285_vm1, %v1529_v9, -inf  ;;  %v290_v19 = vsel %vm285_vm1, %v1532_v10, -inf  ;;  %v292_v20 = vsel %vm285_vm1, %v1535_v11, -inf }
  0x13   : > { %v1559_v21 = vld [vmem:[%s1517_s8 + $0x48] sm:$0xff]  ;;  %v1562_v22 = vld [vmem:[%s1517_s8 + $0x50] sm:$0xff]  ;;  %v1565_v23 = vld [vmem:[%s1517_s8 + $0x58] sm:$0xff]  ;;  %v291_v24 = vmax.f32 %v286_v12, %v290_v19  ;;  %v293_v25 = vmax.f32 %v287_v13, %v292_v20  ;;  %v294_v26 = vsel %vm285_vm1, %v1544_v15, -inf  ;;  %v296_v27 = vsel %vm285_vm1, %v1547_v16, -inf }
  0x14   : > { %v1572_v28 = vld [vmem:[%s1517_s8 + $0x60] sm:$0xff]  ;;  %v1575_v29 = vld [vmem:[%s1517_s8 + $0x68] sm:$0xff]  ;;  %v1578_v30 = vld [vmem:[%s1517_s8 + $0x70] sm:$0xff]  ;;  %v295_v31 = vmax.f32 %v288_v14, %v294_v26  ;;  %v297_v32 = vmax.f32 %v289_v18, %v296_v27  ;;  %v298_v33 = vsel %vm285_vm1, %v1550_v17, -inf  ;;  %v300_v34 = vsel %vm285_vm1, %v1559_v21, -inf }
  0x15   : > { %v1585_v35 = vld [vmem:[%s1517_s8 + $0x78] sm:$0xff]  ;;  %v1588_v36 = vld [vmem:[%s1517_s8 + $0x80] sm:$0xff]  ;;  %v1591_v37 = vld [vmem:[%s1517_s8 + $0x88] sm:$0xff]  ;;  %v299_v38 = vmax.f32 %v291_v24, %v298_v33  ;;  %v301_v39 = vmax.f32 %v293_v25, %v300_v34  ;;  %v302_v40 = vsel %vm285_vm1, %v1562_v22, -inf  ;;  %v304_v41 = vsel %vm285_vm1, %v1565_v23, -inf }
  0x16   : > { %v1598_v42 = vld [vmem:[%s1517_s8 + $0x90] sm:$0xff]  ;;  %v1601_v43 = vld [vmem:[%s1517_s8 + $0x98] sm:$0xff]  ;;  %v303_v44 = vmax.f32 %v295_v31, %v302_v40  ;;  %v305_v45 = vmax.f32 %v297_v32, %v304_v41  ;;  %v306_v46 = vsel %vm285_vm1, %v1572_v28, -inf  ;;  %v308_v47 = vsel %vm285_vm1, %v1575_v29, -inf  ;;  %v1608_v48 = vld [vmem:[%s1517_s8 + $0xa0] sm:$0xff] }
  0x17   : > { %v1611_v49 = vld [vmem:[%s1517_s8 + $0xa8] sm:$0xff]  ;;  %v307_v50 = vmax.f32 %v299_v38, %v306_v46  ;;  %v309_v51 = vmax.f32 %v301_v39, %v308_v47  ;;  %v310_v52 = vsel %vm285_vm1, %v1578_v30, -inf  ;;  %v312_v53 = vsel %vm285_vm1, %v1585_v35, -inf  ;;  %v1618_v54 = vld [vmem:[%s1517_s8 + $0xb0] sm:$0xff]  ;;  %v1621_v55 = vld [vmem:[%s1517_s8 + $0xb8] sm:$0xff] }
  0x18   : > { %v311_v56 = vmax.f32 %v303_v44, %v310_v52  ;;  %v313_v57 = vmax.f32 %v305_v45, %v312_v53  ;;  %v314_v58 = vsel %vm285_vm1, %v1588_v36, -inf  ;;  %v316_v59 = vsel %vm285_vm1, %v1591_v37, -inf  ;;  %v1628_v60 = vld [vmem:[%s1517_s8 + $0xc0] sm:$0xff]  ;;  %v1631_v61 = vld [vmem:[%s1517_s8 + $0xc8] sm:$0xff]  ;;  %v1638_v3 = vld [vmem:[%s1517_s8 + $0xd0] sm:$0xff] }
  0x19   : > { %v315_v62 = vmax.f32 %v307_v50, %v314_v58  ;;  %v317_v63 = vmax.f32 %v309_v51, %v316_v59  ;;  %v318_v0 = vsel %vm285_vm1, %v1598_v42, -inf  ;;  %v320_v1 = vsel %vm285_vm1, %v1601_v43, -inf  ;;  %v1641_v4 = vld [vmem:[%s1517_s8 + $0xd8] sm:$0xff]  ;;  %v1648_v18 = vld [vmem:[%s1517_s8 + $0xe0] sm:$0xff]  ;;  %v1651_v19 = vld [vmem:[%s1517_s8 + $0xe8] sm:$0xff] }
  0x1a   : > { %v319_v5 = vmax.f32 %v311_v56, %v318_v0  ;;  %v321_v12 = vmax.f32 %v313_v57, %v320_v1  ;;  %v322_v13 = vsel %vm285_vm1, %v1608_v48, -inf  ;;  %v324_v14 = vsel %vm285_vm1, %v1611_v49, -inf  ;;  %v1658_v27 = vld [vmem:[%s1517_s8 + $0xf0] sm:$0xff]  ;;  %v284_v31 = vld [vmem:[%s1517_s8 + $0xf8] sm:$0xff] }
  0x1b   : > { %v323_v20 = vmax.f32 %v315_v62, %v322_v13  ;;  %v325_v24 = vmax.f32 %v317_v63, %v324_v14  ;;  %v326_v25 = vsel %vm285_vm1, %v1618_v54, -inf  ;;  %v328_v26 = vsel %vm285_vm1, %v1621_v55, -inf }
  0x1c   : > { %v327_v32 = vmax.f32 %v319_v5, %v326_v25  ;;  %v329_v33 = vmax.f32 %v321_v12, %v328_v26  ;;  %v330_v34 = vsel %vm285_vm1, %v1628_v60, -inf  ;;  %v332_v38 = vsel %vm285_vm1, %v1631_v61, -inf }
  0x1d   : > { %v331_v39 = vmax.f32 %v323_v20, %v330_v34  ;;  %v333_v40 = vmax.f32 %v325_v24, %v332_v38  ;;  %v334_v41 = vsel %vm285_vm1, %v1638_v3, -inf  ;;  %v336_v44 = vsel %vm285_vm1, %v1641_v4, -inf }
  0x1e   : > { %v335_v45 = vmax.f32 %v327_v32, %v334_v41  ;;  %v337_v46 = vmax.f32 %v329_v33, %v336_v44  ;;  %v338_v47 = vsel %vm285_vm1, %v1648_v18, -inf  ;;  %v340_v50 = vsel %vm285_vm1, %v1651_v19, -inf }
  0x1f   : > { %v339_v51 = vmax.f32 %v331_v39, %v338_v47  ;;  %v341_v52 = vmax.f32 %v333_v40, %v340_v50  ;;  %v342_v53 = vsel %vm285_vm1, %v1658_v27, -inf  ;;  %v344_v56 = vsel %vm285_vm1, %v284_v31, -inf }
  0x20   : > { %v343_v57 = vmax.f32 %v335_v45, %v342_v53  ;;  %v345_v58 = vmax.f32 %v337_v46, %v344_v56  ;;  %v474_v63 = vpack.c.bf16 %v1621_v55, %v1618_v54  ;;  %v475_v0 = vpack.c.bf16 %v1631_v61, %v1628_v60 }
  0x21   : > { %v346_v59 = vmax.f32 %v339_v51, %v341_v52  ;;  %v476_v1 = vpack.c.bf16 %v1641_v4, %v1638_v3  ;;  %v477_v12 = vpack.c.bf16 %v1651_v19, %v1648_v18  ;;  %v478_v13 = vpack.c.bf16 %v284_v31, %v1658_v27 }
  0x22   : > { %v347_v62 = vmax.f32 %v343_v57, %v345_v58  ;;  %v463_v54 = vpack.c.bf16 %v1523_v7, %v1520_v6  ;;  %v464_v60 = vpack.c.bf16 %v1529_v9, %v1526_v8  ;;  %v465_v61 = vpack.c.bf16 %v1535_v11, %v1532_v10 }
  0x23   : > { %v466_v6 = vpack.c.bf16 %v1547_v16, %v1544_v15  ;;  %v467_v7 = vpack.c.bf16 %v1559_v21, %v1550_v17  ;;  %v469_v8 = vpack.c.bf16 %v1575_v29, %v1572_v28  ;;  %v470_v9 = vpack.c.bf16 %v1585_v35, %v1578_v30  ;;  %v1377_v16 = vld [vmem:[%s1955_s4] sm:$0xff]   ;;  %v1378_v17 = vld [vmem:[%s1955_s4 + $0x8] sm:$0xff]  }
  0x24   : > { %v348_v5 = vmax.f32 %v346_v59, %v347_v62  ;;  %v471_v10 = vpack.c.bf16 %v1591_v37, %v1588_v36  ;;  %v472_v11 = vpack.c.bf16 %v1601_v43, %v1598_v42  ;;  %v473_v15 = vpack.c.bf16 %v1611_v49, %v1608_v48  ;;  %1326 = vmatprep.subr.bf16.mxu0 %v1377_v16 }
  0x25   : > { %1327 = vmatpush3.bf16.msra.mxu0 %v1377_v16  ;;  %v481_v21 = vlaneseq }
  0x26   : > { %v349_v14 = vrot.slane %v348_v5, 4  ;;  %1328 = vmatprep.subr.bf16.mxu0 %v1378_v17 }
  0x28   : > { %v350_v20 = vmax.f32 %v348_v5, %v349_v14 }
  0x29   : > { %1329 = vmatpush3.bf16.msra.mxu0 %v1378_v17 }
  0x2a   : > { %v351_v24 = vrot.slane %v350_v20, 2 }
  0x2c   : > { %v352_v25 = vmax.f32 %v350_v20, %v351_v24 }
  0x2e   : > { %v353_v26 = vrot.slane %v352_v25, 1 }
  0x30   : > { %v354_v55 = vmax.f32 %v352_v25, %v353_v26 }
  0x32   : > { %1290 = vmatmul.mubr.msk.f32.vlgmr.msra.gmra.mrb[0].mxu1 %vm285_vm1, %v354_v55 }
  0x33   : > { %1293 = vmatpush3.bf16.msra.mxu1 %v1506_v2  ;;  %1294 = vmatprep.mubr.msk.bf16.mxu1 %vm285_vm1, %v463_v54  ;;  %v468_v2 = vpack.c.bf16 %v1565_v23, %v1562_v22  ;;  %v482_v22 = vshrl.u32 %v481_v21, 7  ;;  %v357_v23 = vld [vmem:[%s1953_s2] sm:$0x1] }
  0x35   : > { %v483_v28 = vsub.s32 0, %v482_v22 }
  0x36   : > { %1295 = vmatmul.mubr.msk.bf16.vlgmr.msra.gmra.mrb[4].mxu1 %vm285_vm1, %v464_v60 }
  0x37   : > { %1298 = vmatprep.mubr.msk.bf16.mxu1 %vm285_vm1, %v465_v61 }
  0x3e   : > { %1299 = vmatmul.mubr.msk.bf16.gmra.mrb[8].mxu1 %vm285_vm1, %v466_v6 }
  0x3f   : > { %1302 = vmatprep.mubr.msk.bf16.mxu1 %vm285_vm1, %v467_v7 }
  0x46   : > { %1303 = vmatmul.mubr.msk.bf16.gmra.mrb[12].mxu1 %vm285_vm1, %v468_v2 }
  0x47   : > { %1306 = vmatprep.mubr.msk.bf16.mxu1 %vm285_vm1, %v469_v8 }
  0x4e   : > { %1307 = vmatmul.mubr.msk.bf16.gmra.mrb[16].mxu1 %vm285_vm1, %v470_v9 }
  0x4f   : > { %1310 = vmatprep.mubr.msk.bf16.mxu1 %vm285_vm1, %v471_v10 }
  0x56   : > { %1311 = vmatmul.mubr.msk.bf16.gmra.mrb[20].mxu1 %vm285_vm1, %v472_v11 }
  0x57   : > { %1314 = vmatprep.mubr.msk.bf16.mxu1 %vm285_vm1, %v473_v15 }
  0x5e   : > { %1315 = vmatmul.mubr.msk.bf16.gmra.mrb[24].mxu1 %vm285_vm1, %v474_v63 }
  0x5f   : > { %1318 = vmatprep.mubr.msk.bf16.mxu1 %vm285_vm1, %v475_v0 }
  0x66   : > { %1319 = vmatmul.mubr.msk.bf16.gmra.mrb[28].mxu1 %vm285_vm1, %v476_v1 }
  0x67   : > { %1322 = vmatprep.mubr.msk.bf16.mxu1 %vm285_vm1, %v477_v12 }
  0x6e   : > { %1323 = vmatmul.mubr.msk.bf16.gmra.mrb[32].mxu1 %vm285_vm1, %v478_v13 }
 0x105   : > { %v427_v29 = vpop.f32.mrb[0].mxu1 }
 0x106   : > { %v428_v30 = vadd.f32 %v427_v29, %v357_v23  ;;  %v1291_v35 = vpop.f32.mrb[1].mxu1 }
 0x108   : > { %v1734_v36 = vrot.slane %v428_v30, %v483_v28 }
 0x109   : > { %v1296_v37 = vpop.f32.mrb[4].mxu1 }
 0x10a   : > { %v582_v42 = vadd.f32 %v1296_v37, %v1734_v36  ;;  %v573_v43 = vpop.f32.mrb[5].mxu1 }
 0x10b   : > { %v574_v48 = vadd.f32 %v573_v43, %v1734_v36  ;;  %v1297_v49 = vpop.f32.mrb[6].mxu1 }
 0x10c   : > { %v734_v3 = vmul.f32 0.70710677, %v582_v42  ;;  %v585_v4 = vadd.f32 %v1297_v49, %v1734_v36  ;;  %v576_v18 = vpop.f32.mrb[7].mxu1  ;;  %v702_v0 = vmul.f32 0.5, %v582_v42 }
 0x10d   : > { %v732_v19 = vmul.f32 0.70710677, %v574_v48  ;;  %v577_v27 = vadd.f32 %v576_v18, %v1734_v36  ;;  %v700_v6 = vmul.f32 0.5, %v574_v48 }
 0x10e   : > { %1379 = verf.f32 %v734_v3  ;;  %v735_v31 = vmul.f32 0.70710677, %v585_v4  ;;  %v703_v1 = vmul.f32 0.5, %v585_v4 }
 0x10f   : > { %1381 = verf.f32 %v732_v19  ;;  %v733_v32 = vmul.f32 0.70710677, %v577_v27  ;;  %v701_v7 = vmul.f32 0.5, %v577_v27 }
 0x110   : > { %1383 = verf.f32 %v735_v31 }
 0x111   : > { %1385 = verf.f32 %v733_v32  ;;  %v1300_v33 = vpop.f32.mrb[8].mxu1 }
 0x112   : > { %v598_v34 = vadd.f32 %v1300_v33, %v1734_v36  ;;  %v589_v38 = vpop.f32.mrb[9].mxu1 }
 0x113   : > { %v590_v39 = vadd.f32 %v589_v38, %v1734_v36  ;;  %v1301_v40 = vpop.f32.mrb[10].mxu1 }
 0x114   : > { %v738_v41 = vmul.f32 0.70710677, %v598_v34  ;;  %v601_v44 = vadd.f32 %v1301_v40, %v1734_v36  ;;  %v592_v45 = vpop.f32.mrb[11].mxu1  ;;  %v706_v37 = vmul.f32 0.5, %v598_v34 }
 0x115   : > { %v736_v46 = vmul.f32 0.70710677, %v590_v39  ;;  %v593_v47 = vadd.f32 %v592_v45, %v1734_v36  ;;  %v704_v3 = vmul.f32 0.5, %v590_v39 }
 0x116   : > { %1387 = verf.f32 %v738_v41  ;;  %v739_v50 = vmul.f32 0.70710677, %v601_v44  ;;  %v707_v42 = vmul.f32 0.5, %v601_v44 }
 0x117   : > { %1389 = verf.f32 %v736_v46  ;;  %v737_v51 = vmul.f32 0.70710677, %v593_v47  ;;  %v705_v4 = vmul.f32 0.5, %v593_v47 }
 0x118   : > { %v1380_v52 = vpop.eup %1379  ;;  %1391 = verf.f32 %v739_v50 }
 0x119   : > { %v1382_v53 = vpop.eup %1381  ;;  %v798_v56 = vadd.f32 1.0, %v1380_v52  ;;  %1393 = verf.f32 %v737_v51  ;;  %v1304_v57 = vpop.f32.mrb[12].mxu1 }
 0x11a   : > { %v1384_v58 = vpop.eup %1383  ;;  %v1745_v59 = vadd.f32 %v1304_v57, %v1734_v36  ;;  %v605_v62 = vpop.f32.mrb[13].mxu1  ;;  %v796_v25 = vadd.f32 1.0, %v1382_v53 }
 0x11b   : > { %v1386_v63 = vpop.eup %1385  ;;  %v799_v5 = vadd.f32 1.0, %v1384_v58  ;;  %v1748_v12 = vadd.f32 %v605_v62, %v1734_v36  ;;  %v1305_v13 = vpop.f32.mrb[14].mxu1  ;;  %v830_v54 = vmul.f32 %v798_v56, %v702_v0 }
 0x11c   : > { %v742_v14 = vmul.f32 0.70710677, %v1745_v59  ;;  %v1752_v20 = vadd.f32 %v1305_v13, %v1734_v36  ;;  %v608_v24 = vpop.f32.mrb[15].mxu1  ;;  %v797_v26 = vadd.f32 1.0, %v1386_v63  ;;  %v828_v11 = vmul.f32 %v796_v25, %v700_v6 }
 0x11d   : > { %v831_v55 = vmul.f32 %v799_v5, %v703_v1  ;;  %v740_v60 = vmul.f32 0.70710677, %v1748_v12  ;;  %v1756_v61 = vadd.f32 %v608_v24, %v1734_v36  ;;  %v710_v63 = vmul.f32 0.5, %v1745_v59 }
 0x11e   : > { %1395 = verf.f32 %v742_v14  ;;  %v743_v2 = vmul.f32 0.70710677, %v1752_v20  ;;  %v829_v15 = vmul.f32 %v797_v26, %v701_v7  ;;  %v711_v0 = vmul.f32 0.5, %v1752_v20 }
 0x11f   : > { %v861_v8 = vpack.c.bf16 %v831_v55, %v830_v54  ;;  %1397 = verf.f32 %v740_v60  ;;  %v741_v9 = vmul.f32 0.70710677, %v1756_v61  ;;  %v708_v14 = vmul.f32 0.5, %v1748_v12 }
 0x120   : > { %v1388_v10 = vpop.eup %1387  ;;  %1399 = verf.f32 %v743_v2  ;;  %v860_v30 = vpack.c.bf16 %v829_v15, %v828_v11  ;;  %v709_v24 = vmul.f32 0.5, %v1756_v61 }
 0x121   : > { %v1390_v16 = vpop.eup %1389  ;;  %v802_v17 = vadd.f32 1.0, %v1388_v10  ;;  %1401 = verf.f32 %v741_v9  ;;  %v1308_v21 = vpop.f32.mrb[16].mxu1 }
 0x122   : > { %v1392_v22 = vpop.eup %1391  ;;  %v800_v23 = vadd.f32 1.0, %v1390_v16  ;;  %v1761_v28 = vadd.f32 %v1308_v21, %v1734_v36  ;;  %v621_v29 = vpop.f32.mrb[17].mxu1  ;;  %1330 = vmatprep.mubr.msk.bf16.mxu0 %vm899_vm2, %v860_v30 }
 0x123   : > { %v1394_v35 = vpop.eup %1393  ;;  %v803_v43 = vadd.f32 1.0, %v1392_v22  ;;  %v1764_v48 = vadd.f32 %v621_v29, %v1734_v36  ;;  %v1309_v49 = vpop.f32.mrb[18].mxu1  ;;  %v834_v31 = vmul.f32 %v802_v17, %v706_v37  ;;  %1331 = vmatmul.mubr.msk.bf16.vlgmr.msra.gmra.mrb[0].mxu0 %vm899_vm2, %v861_v8 }
 0x124   : > { %v801_v18 = vadd.f32 1.0, %v1394_v35  ;;  %v746_v19 = vmul.f32 0.70710677, %v1761_v28  ;;  %v624_v27 = vpop.f32.mrb[19].mxu1  ;;  %v633_v34 = vadd.f32 %v1309_v49, %v1734_v36  ;;  %v832_v38 = vmul.f32 %v800_v23, %v704_v3 }
 0x125   : > { %v835_v32 = vmul.f32 %v803_v43, %v707_v42  ;;  %v744_v33 = vmul.f32 0.70710677, %v1764_v48  ;;  %v625_v39 = vadd.f32 %v624_v27, %v1734_v36  ;;  %v714_v23 = vmul.f32 0.5, %v1761_v28 }
 0x126   : > { %v833_v40 = vmul.f32 %v801_v18, %v705_v4  ;;  %1403 = verf.f32 %v746_v19  ;;  %v747_v44 = vmul.f32 0.70710677, %v633_v34  ;;  %v712_v42 = vmul.f32 0.5, %v1764_v48 }
 0x127   : > { %v863_v41 = vpack.c.bf16 %v835_v32, %v834_v31  ;;  %1405 = verf.f32 %v744_v33  ;;  %v745_v47 = vmul.f32 0.70710677, %v625_v39  ;;  %v715_v43 = vmul.f32 0.5, %v633_v34 }
 0x128   : > { %v1396_v45 = vpop.eup %1395  ;;  %v862_v46 = vpack.c.bf16 %v833_v40, %v832_v38  ;;  %1407 = verf.f32 %v747_v44  ;;  %v713_v18 = vmul.f32 0.5, %v625_v39 }
 0x129   : > { %v1398_v50 = vpop.eup %1397  ;;  %v806_v51 = vadd.f32 1.0, %v1396_v45  ;;  %v1312_v52 = vpop.f32.mrb[20].mxu1  ;;  %1409 = verf.f32 %v745_v47 }
 0x12a   : > { %v1400_v53 = vpop.eup %1399  ;;  %v804_v56 = vadd.f32 1.0, %v1398_v50  ;;  %v1773_v57 = vadd.f32 %v1312_v52, %v1734_v36  ;;  %v637_v58 = vpop.f32.mrb[21].mxu1  ;;  %1334 = vmatprep.mubr.msk.bf16.mxu0 %vm899_vm2, %v862_v46 }
 0x12b   : > { %v1402_v62 = vpop.eup %1401  ;;  %v807_v1 = vadd.f32 1.0, %v1400_v53  ;;  %v1779_v5 = vadd.f32 %v637_v58, %v1734_v36  ;;  %v1313_v13 = vpop.f32.mrb[22].mxu1  ;;  %v838_v55 = vmul.f32 %v806_v51, %v710_v63  ;;  %1335 = vmatmul.mubr.msk.bf16.gmra.mrb[4].mxu0 %vm899_vm2, %v863_v41 }
 0x12c   : > { %v805_v25 = vadd.f32 1.0, %v1402_v62  ;;  %v750_v26 = vmul.f32 0.70710677, %v1773_v57  ;;  %v640_v54 = vpop.f32.mrb[23].mxu1  ;;  %v649_v59 = vadd.f32 %v1313_v13, %v1734_v36  ;;  %v836_v20 = vmul.f32 %v804_v56, %v708_v14 }
 0x12d   : > { %v839_v60 = vmul.f32 %v807_v1, %v711_v0  ;;  %v748_v6 = vmul.f32 0.70710677, %v1779_v5  ;;  %v641_v2 = vadd.f32 %v640_v54, %v1734_v36  ;;  %v718_v53 = vmul.f32 0.5, %v1773_v57 }
 0x12e   : > { %v837_v7 = vmul.f32 %v805_v25, %v709_v24  ;;  %1411 = verf.f32 %v750_v26  ;;  %v751_v61 = vmul.f32 0.70710677, %v649_v59  ;;  %v716_v0 = vmul.f32 0.5, %v1779_v5 }
 0x12f   : > { %v865_v12 = vpack.c.bf16 %v839_v60, %v838_v55  ;;  %1413 = verf.f32 %v748_v6  ;;  %v749_v10 = vmul.f32 0.70710677, %v641_v2  ;;  %v719_v1 = vmul.f32 0.5, %v649_v59 }
 0x130   : > { %v1404_v8 = vpop.eup %1403  ;;  %v864_v9 = vpack.c.bf16 %v837_v7, %v836_v20  ;;  %1415 = verf.f32 %v751_v61  ;;  %v717_v25 = vmul.f32 0.5, %v641_v2 }
 0x131   : > { %v1406_v11 = vpop.eup %1405  ;;  %v1316_v15 = vpop.f32.mrb[24].mxu1  ;;  %v810_v16 = vadd.f32 1.0, %v1404_v8  ;;  %1417 = verf.f32 %v749_v10 }
 0x132   : > { %v1789_v17 = vadd.f32 %v1316_v15, %v1734_v36  ;;  %v653_v21 = vpop.f32.mrb[25].mxu1  ;;  %1338 = vmatprep.mubr.msk.bf16.mxu0 %vm899_vm2, %v864_v9  ;;  %v1408_v22 = vpop.eup %1407  ;;  %v808_v29 = vadd.f32 1.0, %v1406_v11 }
 0x133   : > { %v1794_v30 = vadd.f32 %v653_v21, %v1734_v36  ;;  %v1317_v35 = vpop.f32.mrb[26].mxu1  ;;  %v1410_v37 = vpop.eup %1409  ;;  %v811_v49 = vadd.f32 1.0, %v1408_v22  ;;  %1339 = vmatmul.mubr.msk.bf16.gmra.mrb[8].mxu0 %vm899_vm2, %v865_v12  ;;  %v842_v28 = vmul.f32 %v810_v16, %v714_v23 }
 0x134   : > { %v754_v3 = vmul.f32 0.70710677, %v1789_v17  ;;  %v656_v4 = vpop.f32.mrb[27].mxu1  ;;  %v809_v19 = vadd.f32 1.0, %v1410_v37  ;;  %v1800_v31 = vadd.f32 %v1317_v35, %v1734_v36  ;;  %v840_v48 = vmul.f32 %v808_v29, %v712_v42 }
 0x135   : > { %v752_v27 = vmul.f32 0.70710677, %v1794_v30  ;;  %v843_v32 = vmul.f32 %v811_v49, %v715_v43  ;;  %v1804_v33 = vadd.f32 %v656_v4, %v1734_v36  ;;  %v722_v21 = vmul.f32 0.5, %v1789_v17 }
 0x136   : > { %1419 = verf.f32 %v754_v3  ;;  %v841_v34 = vmul.f32 %v809_v19, %v713_v18  ;;  %v755_v38 = vmul.f32 0.70710677, %v1800_v31  ;;  %v720_v37 = vmul.f32 0.5, %v1794_v30 }
 0x137   : > { %1421 = verf.f32 %v752_v27  ;;  %v867_v39 = vpack.c.bf16 %v843_v32, %v842_v28  ;;  %v753_v41 = vmul.f32 0.70710677, %v1804_v33  ;;  %v723_v42 = vmul.f32 0.5, %v1800_v31 }
 0x138   : > { %v1412_v40 = vpop.eup %1411  ;;  %v866_v45 = vpack.c.bf16 %v841_v34, %v840_v48  ;;  %1423 = verf.f32 %v755_v38  ;;  %v721_v4 = vmul.f32 0.5, %v1804_v33 }
 0x139   : > { %v1414_v44 = vpop.eup %1413  ;;  %v1320_v46 = vpop.f32.mrb[28].mxu1  ;;  %v814_v47 = vadd.f32 1.0, %v1412_v40  ;;  %1425 = verf.f32 %v753_v41 }
 0x13a   : > { %v1809_v50 = vadd.f32 %v1320_v46, %v1734_v36  ;;  %v669_v51 = vpop.f32.mrb[29].mxu1  ;;  %v1416_v52 = vpop.eup %1415  ;;  %v812_v56 = vadd.f32 1.0, %v1414_v44  ;;  %1342 = vmatprep.mubr.msk.bf16.mxu0 %vm899_vm2, %v866_v45 }
 0x13b   : > { %v1813_v58 = vadd.f32 %v669_v51, %v1734_v36  ;;  %v1321_v62 = vpop.f32.mrb[30].mxu1  ;;  %v1418_v63 = vpop.eup %1417  ;;  %v815_v13 = vadd.f32 1.0, %v1416_v52  ;;  %1343 = vmatmul.mubr.msk.bf16.gmra.mrb[12].mxu0 %vm899_vm2, %v867_v39  ;;  %v846_v55 = vmul.f32 %v814_v47, %v718_v53 }
 0x13c   : > { %v758_v14 = vmul.f32 0.70710677, %v1809_v50  ;;  %v672_v24 = vpop.f32.mrb[31].mxu1  ;;  %v813_v26 = vadd.f32 1.0, %v1418_v63  ;;  %v681_v57 = vadd.f32 %v1321_v62, %v1734_v36  ;;  %v844_v20 = vmul.f32 %v812_v56, %v716_v0 }
 0x13d   : > { %v756_v54 = vmul.f32 0.70710677, %v1813_v58  ;;  %v847_v60 = vmul.f32 %v815_v13, %v719_v1  ;;  %v673_v6 = vadd.f32 %v672_v24, %v1734_v36  ;;  %v726_v47 = vmul.f32 0.5, %v1809_v50 }
 0x13e   : > { %1427 = verf.f32 %v758_v14  ;;  %v845_v5 = vmul.f32 %v813_v26, %v717_v25  ;;  %v759_v59 = vmul.f32 0.70710677, %v681_v57  ;;  %v724_v52 = vmul.f32 0.5, %v1813_v58 }
 0x13f   : > { %1429 = verf.f32 %v756_v54  ;;  %v869_v12 = vpack.c.bf16 %v847_v60, %v846_v55  ;;  %v757_v61 = vmul.f32 0.70710677, %v673_v6  ;;  %v725_v53 = vmul.f32 0.5, %v673_v6 }
 0x140   : > { %v1420_v7 = vpop.eup %1419  ;;  %v868_v8 = vpack.c.bf16 %v845_v5, %v844_v20  ;;  %1431 = verf.f32 %v759_v59 }
 0x141   : > { %v1422_v2 = vpop.eup %1421  ;;  %v1324_v9 = vpop.f32.mrb[32].mxu1  ;;  %v818_v10 = vadd.f32 1.0, %v1420_v7  ;;  %1433 = verf.f32 %v757_v61 }
 0x142   : > { %v694_v11 = vadd.f32 %v1324_v9, %v1734_v36  ;;  %v685_v15 = vpop.f32.mrb[33].mxu1  ;;  %v1424_v16 = vpop.eup %1423  ;;  %v816_v22 = vadd.f32 1.0, %v1422_v2  ;;  %1346 = vmatprep.mubr.msk.bf16.mxu0 %vm899_vm2, %v868_v8  ;;  %v1843_v9 = vld [vmem:[%s1956_s5] ss:$0 sm:$0xff] }
 0x143   : > { %v686_v23 = vadd.f32 %v685_v15, %v1734_v36  ;;  %v1325_v29 = vpop.f32.mrb[34].mxu1  ;;  %v1426_v35 = vpop.eup %1425  ;;  %v819_v43 = vadd.f32 1.0, %v1424_v16  ;;  %1347 = vmatmul.mubr.msk.bf16.gmra.mrb[16].mxu0 %vm899_vm2, %v869_v12  ;;  %v850_v27 = vmul.f32 %v818_v10, %v722_v21 }
 0x144   : > { %v762_v49 = vmul.f32 0.70710677, %v694_v11  ;;  %v688_v3 = vpop.f32.mrb[35].mxu1  ;;  %v817_v18 = vadd.f32 1.0, %v1426_v35  ;;  %v697_v17 = vadd.f32 %v1325_v29, %v1734_v36  ;;  %v848_v48 = vmul.f32 %v816_v22, %v720_v37 }
 0x145   : > { %v760_v19 = vmul.f32 0.70710677, %v686_v23  ;;  %v851_v28 = vmul.f32 %v819_v43, %v723_v42  ;;  %v689_v32 = vadd.f32 %v688_v3, %v1734_v36  ;;  %v727_v36 = vmul.f32 0.5, %v681_v57 }
 0x146   : > { %1435 = verf.f32 %v762_v49  ;;  %v849_v30 = vmul.f32 %v817_v18, %v721_v4  ;;  %v763_v31 = vmul.f32 0.70710677, %v697_v17  ;;  %v730_v57 = vmul.f32 0.5, %v694_v11 }
 0x147   : > { %1437 = verf.f32 %v760_v19  ;;  %v871_v38 = vpack.c.bf16 %v851_v28, %v850_v27  ;;  %v761_v40 = vmul.f32 0.70710677, %v689_v32  ;;  %v731_v58 = vmul.f32 0.5, %v697_v17 }
 0x148   : > { %v1428_v34 = vpop.eup %1427  ;;  %v870_v33 = vpack.c.bf16 %v849_v30, %v848_v48  ;;  %1439 = verf.f32 %v763_v31  ;;  %v728_v6 = vmul.f32 0.5, %v686_v23  ;;  %v729_v20 = vmul.f32 0.5, %v689_v32 }
 0x149   : > { %v1430_v39 = vpop.eup %1429  ;;  %v822_v41 = vadd.f32 1.0, %v1428_v34  ;;  %1441 = verf.f32 %v761_v40 }
 0x14a   : > { %v1432_v44 = vpop.eup %1431  ;;  %v820_v45 = vadd.f32 1.0, %v1430_v39  ;;  %1350 = vmatprep.mubr.msk.bf16.mxu0 %vm899_vm2, %v870_v33 }
 0x14b   : > { %v1434_v46 = vpop.eup %1433  ;;  %v823_v51 = vadd.f32 1.0, %v1432_v44  ;;  %1351 = vmatmul.mubr.msk.bf16.gmra.mrb[20].mxu0 %vm899_vm2, %v871_v38  ;;  %v854_v62 = vmul.f32 %v822_v41, %v726_v47 }
 0x14c   : > { %v821_v56 = vadd.f32 1.0, %v1434_v46  ;;  %v852_v0 = vmul.f32 %v820_v45, %v724_v52 }
 0x14d   : > { %v855_v63 = vmul.f32 %v823_v51, %v727_v36 }
 0x14e   : > { %v853_v1 = vmul.f32 %v821_v56, %v725_v53 }
 0x14f   : > { %v873_v14 = vpack.c.bf16 %v855_v63, %v854_v62 }
 0x150   : > { %v1436_v13 = vpop.eup %1435  ;;  %v872_v25 = vpack.c.bf16 %v853_v1, %v852_v0 }
 0x151   : > { %v1438_v24 = vpop.eup %1437  ;;  %v826_v26 = vadd.f32 1.0, %v1436_v13 }
 0x152   : > { %v1440_v54 = vpop.eup %1439  ;;  %v824_v55 = vadd.f32 1.0, %v1438_v24  ;;  %1354 = vmatprep.mubr.msk.bf16.mxu0 %vm899_vm2, %v872_v25 }
 0x153   : > { %v1442_v50 = vpop.eup %1441  ;;  %v827_v60 = vadd.f32 1.0, %v1440_v54  ;;  %1355 = vmatmul.mubr.msk.bf16.gmra.mrb[24].mxu0 %vm899_vm2, %v873_v14  ;;  %v858_v59 = vmul.f32 %v826_v26, %v730_v57 }
 0x154   : > { %v825_v5 = vadd.f32 1.0, %v1442_v50  ;;  %v856_v12 = vmul.f32 %v824_v55, %v728_v6 }
 0x155   : > { %v859_v7 = vmul.f32 %v827_v60, %v731_v58 }
 0x156   : > { %v857_v61 = vmul.f32 %v825_v5, %v729_v20 }
 0x157   : > { %v875_v2 = vpack.c.bf16 %v859_v7, %v858_v59 }
 0x158   : > { %v874_v8 = vpack.c.bf16 %v857_v61, %v856_v12 }
 0x15a   : > { %1358 = vmatprep.mubr.msk.bf16.mxu0 %vm899_vm2, %v874_v8 }
 0x15b   : > { %1359 = vmatmul.mubr.msk.bf16.gmra.mrb[28].mxu0 %vm899_vm2, %v875_v2 }
 0x1f6   : > { %v1332_v10 = vpop.f32.mrb[0].mxu0 }
 0x1f7   : > { %v991_v11 = vadd.f32 %v1332_v10, %v1843_v9  ;;  %v982_v15 = vpop.f32.mrb[1].mxu0 }
 0x1f8   : > { %v983_v16 = vadd.f32 %v1843_v9, %v982_v15  ;;  %v1333_v21 = vpop.f32.mrb[2].mxu0 }
 0x1f9   : > { %1112 = vst.msk [vmem:[%s1850_s19 + $0x10] sm:$0xff] %vm1109_vm3, %v991_v11  ;;  %v994_v22 = vadd.f32 %v1333_v21, %v1843_v9  ;;  %v985_v23 = vpop.f32.mrb[3].mxu0 }
 0x1fa   : > { %1110 = vst.msk [vmem:[%s1850_s19] sm:$0xff] %vm1109_vm3, %v983_v16  ;;  %v986_v29 = vadd.f32 %v1843_v9, %v985_v23 }
 0x1fb   : > { %1113 = vst.msk [vmem:[%s1850_s19 + $0x18] sm:$0xff] %vm1109_vm3, %v994_v22 }
 0x1fc   : > { %1111 = vst.msk [vmem:[%s1850_s19 + $0x8] sm:$0xff] %vm1109_vm3, %v986_v29 }
 0x1fe   : > { %v1336_v35 = vpop.f32.mrb[4].mxu0 }
 0x1ff   : > { %v1007_v37 = vadd.f32 %v1336_v35, %v1843_v9  ;;  %v998_v42 = vpop.f32.mrb[5].mxu0 }
 0x200   : > { %v999_v43 = vadd.f32 %v1843_v9, %v998_v42  ;;  %v1337_v49 = vpop.f32.mrb[6].mxu0 }
 0x201   : > { %1116 = vst.msk [vmem:[%s1850_s19 + $0x30] sm:$0xff] %vm1109_vm3, %v1007_v37  ;;  %v1010_v3 = vadd.f32 %v1337_v49, %v1843_v9  ;;  %v1001_v4 = vpop.f32.mrb[7].mxu0 }
 0x202   : > { %1114 = vst.msk [vmem:[%s1850_s19 + $0x20] sm:$0xff] %vm1109_vm3, %v999_v43  ;;  %v1002_v18 = vadd.f32 %v1843_v9, %v1001_v4 }
 0x203   : > { %1117 = vst.msk [vmem:[%s1850_s19 + $0x38] sm:$0xff] %vm1109_vm3, %v1010_v3 }
 0x204   : > { %1115 = vst.msk [vmem:[%s1850_s19 + $0x28] sm:$0xff] %vm1109_vm3, %v1002_v18 }
 0x206   : > { %v1340_v19 = vpop.f32.mrb[8].mxu0 }
 0x207   : > { %v1023_v17 = vadd.f32 %v1340_v19, %v1843_v9  ;;  %v1014_v27 = vpop.f32.mrb[9].mxu0 }
 0x208   : > { %v1015_v28 = vadd.f32 %v1843_v9, %v1014_v27  ;;  %v1341_v32 = vpop.f32.mrb[10].mxu0 }
 0x209   : > { %1120 = vst.msk [vmem:[%s1850_s19 + $0x50] sm:$0xff] %vm1109_vm3, %v1023_v17  ;;  %v1026_v48 = vadd.f32 %v1341_v32, %v1843_v9  ;;  %v1017_v30 = vpop.f32.mrb[11].mxu0 }
 0x20a   : > { %1118 = vst.msk [vmem:[%s1850_s19 + $0x40] sm:$0xff] %vm1109_vm3, %v1015_v28  ;;  %v1018_v31 = vadd.f32 %v1843_v9, %v1017_v30 }
 0x20b   : > { %1121 = vst.msk [vmem:[%s1850_s19 + $0x58] sm:$0xff] %vm1109_vm3, %v1026_v48 }
 0x20c   : > { %1119 = vst.msk [vmem:[%s1850_s19 + $0x48] sm:$0xff] %vm1109_vm3, %v1018_v31 }
 0x20e   : > { %v1344_v34 = vpop.f32.mrb[12].mxu0 }
 0x20f   : > { %v1039_v38 = vadd.f32 %v1344_v34, %v1843_v9  ;;  %v1030_v40 = vpop.f32.mrb[13].mxu0 }
 0x210   : > { %v1031_v39 = vadd.f32 %v1843_v9, %v1030_v40  ;;  %v1345_v33 = vpop.f32.mrb[14].mxu0 }
 0x211   : > { %1124 = vst.msk [vmem:[%s1850_s19 + $0x70] sm:$0xff] %vm1109_vm3, %v1039_v38  ;;  %v1042_v41 = vadd.f32 %v1345_v33, %v1843_v9  ;;  %v1033_v44 = vpop.f32.mrb[15].mxu0 }
 0x212   : > { %1122 = vst.msk [vmem:[%s1850_s19 + $0x60] sm:$0xff] %vm1109_vm3, %v1031_v39  ;;  %v1034_v45 = vadd.f32 %v1843_v9, %v1033_v44 }
 0x213   : > { %1125 = vst.msk [vmem:[%s1850_s19 + $0x78] sm:$0xff] %vm1109_vm3, %v1042_v41 }
 0x214   : > { %1123 = vst.msk [vmem:[%s1850_s19 + $0x68] sm:$0xff] %vm1109_vm3, %v1034_v45 }
 0x216   : > { %v1348_v46 = vpop.f32.mrb[16].mxu0 }
 0x217   : > { %v1055_v47 = vadd.f32 %v1348_v46, %v1843_v9  ;;  %v1046_v36 = vpop.f32.mrb[17].mxu0 }
 0x218   : > { %v1047_v51 = vadd.f32 %v1843_v9, %v1046_v36  ;;  %v1349_v52 = vpop.f32.mrb[18].mxu0 }
 0x219   : > { %1128 = vst.msk [vmem:[%s1850_s19 + $0x90] sm:$0xff] %vm1109_vm3, %v1055_v47  ;;  %v1058_v53 = vadd.f32 %v1349_v52, %v1843_v9  ;;  %v1049_v56 = vpop.f32.mrb[19].mxu0 }
 0x21a   : > { %1126 = vst.msk [vmem:[%s1850_s19 + $0x80] sm:$0xff] %vm1109_vm3, %v1047_v51  ;;  %v1050_v62 = vadd.f32 %v1843_v9, %v1049_v56 }
 0x21b   : > { %1129 = vst.msk [vmem:[%s1850_s19 + $0x98] sm:$0xff] %vm1109_vm3, %v1058_v53 }
 0x21c   : > { %1127 = vst.msk [vmem:[%s1850_s19 + $0x88] sm:$0xff] %vm1109_vm3, %v1050_v62 }
 0x21e   : > { %v1352_v63 = vpop.f32.mrb[20].mxu0 }
 0x21f   : > { %v1071_v0 = vadd.f32 %v1352_v63, %v1843_v9  ;;  %v1062_v1 = vpop.f32.mrb[21].mxu0 }
 0x220   : > { %v1063_v13 = vadd.f32 %v1843_v9, %v1062_v1  ;;  %v1353_v14 = vpop.f32.mrb[22].mxu0 }
 0x221   : > { %1132 = vst.msk [vmem:[%s1850_s19 + $0xb0] sm:$0xff] %vm1109_vm3, %v1071_v0  ;;  %v1074_v24 = vadd.f32 %v1353_v14, %v1843_v9  ;;  %v1065_v25 = vpop.f32.mrb[23].mxu0 }
 0x222   : > { %1130 = vst.msk [vmem:[%s1850_s19 + $0xa0] sm:$0xff] %vm1109_vm3, %v1063_v13  ;;  %v1066_v26 = vadd.f32 %v1843_v9, %v1065_v25 }
 0x223   : > { %1133 = vst.msk [vmem:[%s1850_s19 + $0xb8] sm:$0xff] %vm1109_vm3, %v1074_v24 }
 0x224   : > { %1131 = vst.msk [vmem:[%s1850_s19 + $0xa8] sm:$0xff] %vm1109_vm3, %v1066_v26 }
 0x226   : > { %v1356_v54 = vpop.f32.mrb[24].mxu0 }
 0x227   : > { %v1087_v55 = vadd.f32 %v1356_v54, %v1843_v9  ;;  %v1078_v50 = vpop.f32.mrb[25].mxu0 }
 0x228   : > { %v1079_v57 = vadd.f32 %v1843_v9, %v1078_v50  ;;  %v1357_v58 = vpop.f32.mrb[26].mxu0 }
 0x229   : > { %1136 = vst.msk [vmem:[%s1850_s19 + $0xd0] sm:$0xff] %vm1109_vm3, %v1087_v55  ;;  %v1090_v60 = vadd.f32 %v1357_v58, %v1843_v9  ;;  %v1081_v6 = vpop.f32.mrb[27].mxu0 }
 0x22a   : > { %1134 = vst.msk [vmem:[%s1850_s19 + $0xc0] sm:$0xff] %vm1109_vm3, %v1079_v57  ;;  %v1082_v20 = vadd.f32 %v1843_v9, %v1081_v6 }
 0x22b   : > { %1137 = vst.msk [vmem:[%s1850_s19 + $0xd8] sm:$0xff] %vm1109_vm3, %v1090_v60 }
 0x22c   : > { %1135 = vst.msk [vmem:[%s1850_s19 + $0xc8] sm:$0xff] %vm1109_vm3, %v1082_v20 }
 0x22e   : > { %v1360_v5 = vpop.f32.mrb[28].mxu0 }
 0x22f   : > { %v1103_v59 = vadd.f32 %v1360_v5, %v1843_v9  ;;  %v1094_v7 = vpop.f32.mrb[29].mxu0 }
 0x230   : > { %v1095_v12 = vadd.f32 %v1843_v9, %v1094_v7  ;;  %v1361_v61 = vpop.f32.mrb[30].mxu0 }
 0x231   : > { %1140 = vst.msk [vmem:[%s1850_s19 + $0xf0] sm:$0xff] %vm1109_vm3, %v1103_v59  ;;  %v1106_v2 = vadd.f32 %v1361_v61, %v1843_v9  ;;  %v1097_v8 = vpop.f32.mrb[31].mxu0 }
 0x232   : > { %1138 = vst.msk [vmem:[%s1850_s19 + $0xe0] sm:$0xff] %vm1109_vm3, %v1095_v12  ;;  %v1098_v10 = vadd.f32 %v1843_v9, %v1097_v8 }
 0x233   : > { %1141 = vst.msk [vmem:[%s1850_s19 + $0xf8] sm:$0xff] %vm1109_vm3, %v1106_v2 }
 0x234   : > { %1139 = vst.msk [vmem:[%s1850_s19 + $0xe8] sm:$0xff] %vm1109_vm3, %v1098_v10 }
 0x235 PF: > { %s16_s21 = sadd.s32 1, %s1449_s21  }
 0x236   : > { %p13_p4 = scmp.ge.s32.totalorder %s16_s21, 4  }
 0x238   :  { %15 = sbr.rel (!%p13_p4) target bundleno = 1 (0x1), region = 74 }

</bundles_post_ra>
